<compile_context>
chip_gen: v7x
topology: tpu7x:2x2x1
jax: 0.10.0
libtpu: 0.0.40
codegen_flags: <defaults>
</compile_context>

<pallas_src>
import jax
import jax.numpy as jnp
from jax.experimental import pallas as pl
from jax.experimental.pallas import tpu as pltpu  # noqa: F401  (imported per convention)

IN_F = 4     # l0 in_features
HID = 2      # l0 out_features / l1 in_features
OUT_F = 1    # l1 out_features

# Packed parameter tile layout, a single (8, 128) f32 vreg-sized tile:
#   P[0:2, 0:4] = W0                  (HID, IN_F)
#   P[0:2, 4]   = b0                  (HID,)   stored as a column
#   P[0:2, 5]   = W1[0, :]            (HID,)   stored as a column
#   P[0,   6]   = b1[0]
PACK_R = 8
PACK_C = 128


def _mlp_kernel(x_ref, p_ref, o_ref):
    # x_ref: (1, IN_F)        per-call input row
    # p_ref: (PACK_R, PACK_C) packed static parameters
    # o_ref: (1, OUT_F)       result
    x = x_ref[...]                                   # (1, 4)
    w0 = p_ref[0:HID, 0:IN_F]                        # (2, 4)
    b0 = p_ref[0:HID, IN_F:IN_F + 1]                 # (2, 1)
    w1 = p_ref[0:HID, IN_F + 1:IN_F + 2]             # (2, 1)  == W1[0,:] as column
    b1 = p_ref[0:1, IN_F + 2:IN_F + 3]               # (1, 1)

    # l0: h_j = sum_k x_k * W0[j,k] + b0[j]   (VPU multiply + small lane reduce)
    h = jnp.sum(x * w0, axis=1, keepdims=True) + b0  # (2, 1)
    h = jnp.maximum(h, 0.0)                          # ReLU
    # l1: o = sum_j h_j * W1[0,j] + b1        (VPU multiply + small sublane reduce)
    o = jnp.sum(h * w1, axis=0, keepdims=True) + b1  # (1, 1)
    o_ref[...] = o.astype(o_ref.dtype)


def pack_params(params):
    """Pack all parameters into one (8, 128) f32 tile. Call ONCE at init."""
    w0 = params["w0"].astype(jnp.float32)            # (HID, IN_F)
    b0 = params["b0"].astype(jnp.float32)            # (HID,)
    w1 = params["w1"].astype(jnp.float32)            # (OUT_F, HID)
    b1 = params["b1"].astype(jnp.float32)            # (OUT_F,)
    p = jnp.zeros((PACK_R, PACK_C), jnp.float32)
    p = p.at[0:HID, 0:IN_F].set(w0)
    p = p.at[0:HID, IN_F].set(b0)
    p = p.at[0:HID, IN_F + 1].set(w1[0, :])
    p = p.at[0, IN_F + 2].set(b1[0])
    return p


@jax.jit
def _forward_1d(x, packed_params):
    x2d = x.astype(jnp.float32).reshape(1, IN_F)
    out = pl.pallas_call(
        _mlp_kernel,
        out_shape=jax.ShapeDtypeStruct((1, OUT_F), jnp.float32),
        grid=(),
        in_specs=[
            pl.BlockSpec((1, IN_F), lambda: (0, 0)),        # full-array block
            pl.BlockSpec((PACK_R, PACK_C), lambda: (0, 0)),  # full-array block
        ],
        out_specs=pl.BlockSpec((1, OUT_F), lambda: (0, 0)),
    )(x2d, packed_params)
    return out[0]                                   # shape (1,), like torch Linear(2,1)


def control_flow_module(x, packed_params):
    """Forward pass of ControlFlowModule.

    x: 1-D array of shape (4,) -> returns shape (1,) float32
    x with ndim > 1            -> returns scalar int32 0 (torch.tensor(0))
    """
    if x.ndim > 1:
        # Static control flow, resolved at trace time (same as torch's dim check).
        return jnp.array(0, dtype=jnp.int32)
    return _forward_1d(x, packed_params)


def init_params(key):
    """Deterministic init matching nn.Linear shapes (uniform +-1/sqrt(fan_in))."""
    k0, k1, k2, k3 = jax.random.split(key, 4)
    lim0 = 1.0 / jnp.sqrt(jnp.float32(IN_F))
    lim1 = 1.0 / jnp.sqrt(jnp.float32(HID))
    return {
        "w0": jax.random.uniform(k0, (HID, IN_F), jnp.float32, -lim0, lim0),
        "b0": jax.random.uniform(k1, (HID,), jnp.float32, -lim0, lim0),
        "w1": jax.random.uniform(k2, (OUT_F, HID), jnp.float32, -lim1, lim1),
        "b1": jax.random.uniform(k3, (OUT_F,), jnp.float32, -lim1, lim1),
    }


if __name__ == "__main__":
    key = jax.random.PRNGKey(0)
    kp, kx = jax.random.split(key)
    params = init_params(kp)
    packed = pack_params(params)          # static parameter prep, hoisted out of call path

    # 1-D input path (the real compute path)
    x = jax.random.normal(kx, (IN_F,), dtype=jnp.float32)
    out = jax.block_until_ready(control_flow_module(x, packed))

    # Reference check in plain JAX
    ref = jnp.maximum(x @ params["w0"].T + params["b0"], 0.0) @ params["w1"].T + params["b1"]
    assert out.shape == (OUT_F,), out.shape
    assert jnp.allclose(out, ref, atol=1e-5), (out, ref)

    # ndim > 1 path (control flow branch, resolved statically in the wrapper)
    x2 = jax.random.normal(kx, (2, IN_F), dtype=jnp.float32)
    out2 = jax.block_until_ready(control_flow_module(x2, packed))
    assert int(out2) == 0

    print("KERNEL_OK")
</pallas_src>

<mosaic_0001>
module attributes {stable_mosaic.version = 11 : i64} {
  func.func @_mlp_kernel(%arg0: memref<1x4xf32, #tpu.memory_space<vmem>>, %arg1: memref<8x128xf32, #tpu.memory_space<vmem>>, %arg2: memref<1x1xf32, #tpu.memory_space<vmem>>) attributes {dimension_semantics = [], scalar_prefetch = 0 : i64, scratch_operands = 0 : i64, tpu.core_type = #tpu.core_type<tc>} {
    %c0 = arith.constant 0 : index
    %c0_0 = arith.constant 0 : index
    %0 = vector.load %arg0[%c0, %c0_0] : memref<1x4xf32, #tpu.memory_space<vmem>>, vector<1x4xf32>
    %c0_1 = arith.constant 0 : index
    %c0_2 = arith.constant 0 : index
    %1 = vector.load %arg1[%c0_1, %c0_2] : memref<8x128xf32, #tpu.memory_space<vmem>>, vector<2x4xf32>
    %c0_3 = arith.constant 0 : index
    %c4 = arith.constant 4 : index
    %2 = vector.load %arg1[%c0_3, %c4] : memref<8x128xf32, #tpu.memory_space<vmem>>, vector<2x1xf32>
    %c0_4 = arith.constant 0 : index
    %c5 = arith.constant 5 : index
    %3 = vector.load %arg1[%c0_4, %c5] : memref<8x128xf32, #tpu.memory_space<vmem>>, vector<2x1xf32>
    %c0_5 = arith.constant 0 : index
    %c6 = arith.constant 6 : index
    %4 = vector.load %arg1[%c0_5, %c6] : memref<8x128xf32, #tpu.memory_space<vmem>>, vector<1x1xf32>
    %5 = vector.broadcast %0 : vector<1x4xf32> to vector<2x4xf32>
    %6 = arith.mulf %5, %1 : vector<2x4xf32>
    %cst = arith.constant dense<0.000000e+00> : vector<2xf32>
    %7 = vector.multi_reduction <add>, %6, %cst [1] : vector<2x4xf32> to vector<2xf32>
    %8 = vector.shape_cast %7 : vector<2xf32> to vector<2x1xf32>
    %9 = arith.addf %8, %2 : vector<2x1xf32>
    %cst_6 = arith.constant 0.000000e+00 : f32
    %10 = vector.broadcast %cst_6 : f32 to vector<2x1xf32>
    %11 = arith.maximumf %9, %10 : vector<2x1xf32>
    %12 = arith.mulf %11, %3 : vector<2x1xf32>
    %cst_7 = arith.constant dense<0.000000e+00> : vector<1xf32>
    %13 = vector.multi_reduction <add>, %12, %cst_7 [0] : vector<2x1xf32> to vector<1xf32>
    %14 = vector.shape_cast %13 : vector<1xf32> to vector<1x1xf32>
    %15 = arith.addf %14, %4 : vector<1x1xf32>
    %c0_8 = arith.constant 0 : index
    %c0_9 = arith.constant 0 : index
    %16 = vector.load %arg2[%c0_8, %c0_9] : memref<1x1xf32, #tpu.memory_space<vmem>>, vector<1x1xf32>
    tpu.vector_store %arg2[%c0_8, %c0_9], %15 {strides = array<i32>} : memref<1x1xf32, #tpu.memory_space<vmem>>, vector<1x1xf32>,
    return
  }
}

</mosaic_0001>

<bundles_post_ra>
// kernel: _forward_1d.1
= control target key start
LH: loop header
LB: loop body
LE: loop exit
PB: predicated region body
PF: predicated region fallthrough
CT: control target
= control target key end

     0   :  { %7 = vsyncpa [#allocation3], 0  ;;  %s180_s0 = inlined_call_operand.vmem [shape: f32[1,4], index: 0, kind: input, shape index: {}]   ;;  %s181_s1 = inlined_call_operand.hbm [shape: f32[8,128], index: 1, kind: input, shape index: {}]   ;;  %s182_s2 = inlined_call_operand.hbm [shape: f32[1,1], index: 2, kind: output, shape index: {}]  }
   0x1   :  { %8 = vsyncpa [#allocation4], 0  ;;  %s133_s9 = smov [#allocation2]   ;;  %s85_s13 = scalar_lea.hbm %s181_s1, 128 }
   0x2   :  { %s17_s10 = sshll.u32 %s133_s9, 4  ;;  %p86_p0 = scmp.ne.s32.totalorder %s181_s1, %s85_s13  ;;  %s18_s10 = int_to_ptr.vmem [resolvable:$true] %s17_s10 }
   0x3   :  { %p89_p1 = scmp.lt.u32.totalorder %s85_s13, %s181_s1 }
   0x5   :  { %p91_p2 = pnand %p89_p1, %p86_p0 }
   0x7   :  { %94 = shalt.err (!%p91_p2)
}
   0x8   :  { %s95_s18 = scalar_lea.vmem %s18_s10, 128  ;;  %p100_p4 = scmp.lt.s32.totalorder %s18_s10, %s18_s10 }
   0x9   :  { %p96_p3 = scmp.ne.s32.totalorder %s18_s10, %s95_s18  ;;  %p101_p5 = scmp.lt.s32.totalorder %s95_s18, %s95_s18 }
   0xb   :  { %p102_p6 = por %p101_p5, %p100_p4 }
   0xd   :  { %p103_p7 = pnand %p102_p6, %p96_p3 }
   0xf   :  { %106 = shalt.err (!%p103_p7)
}
  0x10   :  { %20 = dma.hbm_to_vmem [thread:$0]  %s181_s1, 128, %s18_s10, [#allocation3]  }
  0x11   :  { %129 = dma.done.wait [#allocation3], 128  }
  0x12   :  { %130 = vsyncadd [#allocation3], 4294967168  ;;  %vm34_vm0 = vcmask 25600   ;;  %v79_v0 = vld [vmem:[%s180_s0] ss:$0 sm:$0xff]  ;;  %s134_s23 = smov 126  }
  0x13   :  { %v25_v1 = vld [vmem:[#allocation2] sm:$0x3]  ;;  %s135_s24 = smov 127   ;;  %vm45_vm1 = vcmask 33824   ;;  %s136_s0 = smov 124   ;;  %vm62_vm2 = vcmask 0  }
  0x14   :  { %v26_v2 = vld [vmem:[#allocation2] sm:$0x1]  ;;  %v33_v3 = vmul.f32 %v79_v0, %v25_v1  ;;  %s137_s1 = smov [#allocation5]  }
  0x15   :  { %54 = vrot.lane.b32.xlu1 %v26_v2, %s134_s23  ;;  %s70_s25 = sshll.u32 %s137_s1, 4  ;;  %s71_s25 = int_to_ptr.vmem [resolvable:$true] %s70_s25 }
  0x16   :  { %v35_v4 = vsel %vm34_vm0, %v33_v3, 0.0  ;;  %s107_s26 = scalar_lea.vmem %s71_s25, 16  ;;  %s111_s27 = scalar_lea.vmem %s71_s25, 32 }
  0x17   :  { %36 = vadd.xlane.f32.xlu0 %v35_v4  ;;  %p108_p8 = scmp.ne.s32.totalorder %s71_s25, %s107_s26  ;;  %p112_p9 = scmp.lt.s32.totalorder %s71_s25, %s71_s25 }
  0x18   :  { %p113_p10 = scmp.lt.s32.totalorder %s111_s27, %s107_s26 }
  0x1a   :  { %p114_p11 = por %p113_p10, %p112_p9 }
  0x1c   :  { %p115_p12 = pnand %p114_p11, %p108_p8 }
  0x2d   :  { %41 = vrot.lane.b32.xlu0 %v25_v1, %s135_s24 }
  0x87   :  { %v55_v16 = vpop.permute.xlu1 %54 }
  0xa4   :  { %v37_v5 = vpop.xlane.xlu0 %36 }
  0xa5   :  { %v38_v6 = vadd.f32 %v37_v5, %v25_v1 }
  0xa7   :  { %v39_v7 = vmax.f32 %v38_v6, 0.0 }
  0xa8   :  { %v42_v8 = vpop.permute.xlu0 %41 }
  0xa9   :  { %v44_v9 = vmul.f32 %v42_v8, %v39_v7 }
  0xab   :  { %v46_v10 = vsel %vm45_vm1, %v44_v9, 0.0 }
  0xac   :  { %v47_v11 = vrot.slane %v46_v10, 4 }
  0xae   :  { %v48_v12 = vadd.f32 %v47_v11, %v46_v10 }
  0xb0   :  { %v49_v13 = vrot.slane %v48_v12, 2 }
  0xb2   :  { %v50_v14 = vadd.f32 %v49_v13, %v48_v12 }
  0xb4   :  { %v51_v15 = vrot.slane %v50_v14, 1 }
  0xb6   :  { %v52_v17 = vadd.f32 %v51_v15, %v50_v14 }
  0xb8   :  { %v57_v18 = vadd.f32 %v55_v16, %v52_v17 }
  0xba   :  { %59 = vrot.lane.b32.xlu1 %v57_v18, %s136_s0 }
 0x12c   :  { %v60_v19 = vpop.permute.xlu1 %59 }
 0x12d   :  { %63 = vst.msk [vmem:[#allocation5] sm:$0x1] %vm62_vm2, %v60_v19 }
 0x12e   :  { %118 = shalt.err (!%p115_p12)
}
 0x12f   :  { %s119_s30 = scalar_lea.hbm %s182_s2, 16 }
 0x130   :  { %p120_p13 = scmp.ne.s32.totalorder %s182_s2, %s119_s30  ;;  %p123_p0 = scmp.lt.u32.totalorder %s119_s30, %s182_s2 }
 0x132   :  { %p125_p1 = pnand %p123_p0, %p120_p13 }
 0x134   :  { %128 = shalt.err (!%p125_p1)
}
 0x135   :  { %73 = dma.vmem_to_hbm [thread:$0]  %s71_s25, 16, %s182_s2, [#allocation4]  }
 0x136   :  { %131 = dma.done.wait [#allocation4], 16  }
 0x137   :  { %132 = vsyncadd [#allocation4], 4294967280 }
 0x138   :  { %77 = vsyncpa [#allocation3], 1 }
 0x139   :  { %78 = vsyncpa [#allocation4], 1 }

</bundles_post_ra>
